<compile_context>
chip_gen: v6e
topology: v6e:2x2x1
jax: 0.10.0
libtpu: 0.0.40
codegen_flags: <defaults>
</compile_context>

<pallas_src>
import math

import jax
import jax.numpy as jnp
from jax.experimental import pallas as pl
from jax.experimental.pallas import tpu as pltpu


_TM_CANDIDATES = (8192, 4096, 2048, 1024, 512, 256, 128, 64, 32, 16, 8)


def _pick_tm(batch):
    """Largest aligned batch tile dividing `batch`, preferring grid >= 2 (v7x)."""
    for tm in _TM_CANDIDATES:
        if batch % tm == 0 and batch // tm >= 2:
            return tm
    for tm in _TM_CANDIDATES:
        if batch % tm == 0:
            return tm
    return batch  # tiny/odd batch: single whole-array block


def _affine_kernel(x_ref, w_ref, b_ref, o_ref):
    # x_ref: (tm, Din) f32, w_ref: (Din, Dout) bf16, b_ref: (1, Dout) f32.
    h = x_ref[...].astype(w_ref.dtype)        # cast on-core: no extra HBM round trip
    acc = jnp.dot(h, w_ref[...], preferred_element_type=jnp.float32) + b_ref[...]
    o_ref[...] = acc.astype(o_ref.dtype)      # single f32 HBM store


def fused_mlp(x, w_fused, b_fused):
    """y = x @ W_total + b_total as one pallas_call, batch tiled on a parallel grid."""
    B, Din = x.shape
    Dout = w_fused.shape[1]

    tm = _pick_tm(B)
    grid = (B // tm,)

    return pl.pallas_call(
        _affine_kernel,
        out_shape=jax.ShapeDtypeStruct((B, Dout), x.dtype),
        grid_spec=pl.GridSpec(
            grid=grid,
            in_specs=[
                pl.BlockSpec((tm, Din), lambda i: (i, 0)),     # x tile (f32)
                pl.BlockSpec((Din, Dout), lambda i: (0, 0)),   # fused weight (bf16), resident
                pl.BlockSpec((1, Dout), lambda i: (0, 0)),     # fused bias (f32), resident
            ],
            out_specs=pl.BlockSpec((tm, Dout), lambda i: (i, 0)),
        ),
        compiler_params=pltpu.CompilerParams(
            # Batch tiles are independent -> shard across both TCs on v7x.
            # VMEM use is tiny (<4 MiB double-buffered at tm=8192), so the
            # scoped default (16/32 MiB) is never exceeded; no vmem_limit_bytes
            # override needed at these sizes.
            dimension_semantics=("parallel",),
        ),
    )(x, w_fused, b_fused)


def init_mlp_params(key, sizes):
    """PyTorch nn.Linear-style init: U(-1/sqrt(fan_in), 1/sqrt(fan_in)).

    Weights stored already transposed as (fan_in, fan_out) so each layer is
    y = x @ W + b.
    """
    params = []
    for l in range(1, len(sizes)):
        fan_in, fan_out = sizes[l - 1], sizes[l]
        key, kw, kb = jax.random.split(key, 3)
        bound = 1.0 / math.sqrt(fan_in)
        w = jax.random.uniform(kw, (fan_in, fan_out), jnp.float32, -bound, bound)
        b = jax.random.uniform(kb, (1, fan_out), jnp.float32, -bound, bound)
        params.append((w, b))
    return params


def prepare_fused_params(params, compute_dtype=jnp.bfloat16):
    """Collapse the activation-free Linear stack into one affine map (in f32),
    then cast the fused weight to the MXU compute dtype ONCE."""
    w_total, b_total = params[0]
    for (w, b) in params[1:]:
        b_total = b_total @ w + b          # ((b1@W2)+b2)@W3 + b3 ...
        w_total = w_total @ w              # W1@W2@W3 ...
    return w_total.astype(compute_dtype), b_total.astype(jnp.float32)


@jax.jit
def mlp_forward(x, w_fused, b_fused):
    return fused_mlp(x, w_fused, b_fused)


def reference_mlp_f32(x, params):
    """Pure-f32 layer-wise reference (matches PyTorch nn.Sequential of Linear)."""
    h = x
    for (w, b) in params:
        h = h @ w + b
    return h


def reference_affine(x, w_fused, b_fused):
    """Reference mirroring the kernel math exactly (bf16 inputs, f32 accumulate)."""
    return jnp.dot(x.astype(w_fused.dtype), w_fused,
                   preferred_element_type=jnp.float32) + b_fused


if __name__ == "__main__":
    key = jax.random.PRNGKey(0)
    sizes = [32, 64, 48, 16]              # MLP(sizes) -> 3 Linear layers
    kx, kp, kx2 = jax.random.split(key, 3)
    params = init_mlp_params(kp, sizes)
    w_fused, b_fused = prepare_fused_params(params)   # one-time collapse + cast

    # --- small batch: single whole-array block ---
    batch = 2
    x = jax.random.normal(kx, (batch, sizes[0]), jnp.float32)
    out = jax.block_until_ready(mlp_forward(x, w_fused, b_fused))
    assert out.shape == (batch, sizes[-1])
    assert jnp.allclose(out, reference_affine(x, w_fused, b_fused),
                        atol=1e-3, rtol=1e-3), "small-batch kernel/affine mismatch"
    assert jnp.allclose(out, reference_mlp_f32(x, params),
                        atol=3e-2, rtol=3e-2), "small-batch kernel/f32 mismatch"

    # --- larger batch: tiled, multi-step "parallel" grid (tm=512 -> grid=(2,)) ---
    batch2 = 1024
    x2 = jax.random.normal(kx2, (batch2, sizes[0]), jnp.float32)
    out2 = jax.block_until_ready(mlp_forward(x2, w_fused, b_fused))
    assert out2.shape == (batch2, sizes[-1])
    assert jnp.allclose(out2, reference_affine(x2, w_fused, b_fused),
                        atol=1e-3, rtol=1e-3), "tiled-batch kernel/affine mismatch"
    assert jnp.allclose(out2, reference_mlp_f32(x2, params),
                        atol=3e-2, rtol=3e-2), "tiled-batch kernel/f32 mismatch"

    print("KERNEL_OK")
</pallas_src>

<mosaic_0001>
module attributes {stable_mosaic.version = 11 : i64} {
  func.func @_affine_kernel(%arg0: i32, %arg1: memref<2x32xf32, #tpu.memory_space<vmem>>, %arg2: memref<32x16xbf16, #tpu.memory_space<vmem>>, %arg3: memref<1x16xf32, #tpu.memory_space<vmem>>, %arg4: memref<2x16xf32, #tpu.memory_space<vmem>>) attributes {dimension_semantics = [#tpu.dimension_semantics<parallel>], iteration_bounds = array<i64: 1>, scalar_prefetch = 0 : i64, scratch_operands = 0 : i64, tpu.core_type = #tpu.core_type<tc>, window_params = [{transform_indices = @transform_0, window_bounds = array<i64: 2, 32>}, {pipeline_mode = #tpu.pipeline_mode<synchronous>, transform_indices = @transform_1, window_bounds = array<i64: 32, 16>}, {pipeline_mode = #tpu.pipeline_mode<synchronous>, transform_indices = @transform_2, window_bounds = array<i64: 1, 16>}, {transform_indices = @transform_3, window_bounds = array<i64: 2, 16>}]} {
    %c0 = arith.constant 0 : index
    %c0_0 = arith.constant 0 : index
    %0 = vector.load %arg1[%c0, %c0_0] : memref<2x32xf32, #tpu.memory_space<vmem>>, vector<2x32xf32>
    %1 = arith.truncf %0 : vector<2x32xf32> to vector<2x32xbf16>
    %c0_1 = arith.constant 0 : index
    %c0_2 = arith.constant 0 : index
    %2 = vector.load %arg2[%c0_1, %c0_2] : memref<32x16xbf16, #tpu.memory_space<vmem>>, vector<32x16xbf16>
    %cst = arith.constant dense<0.000000e+00> : vector<2x16xf32>
    %3 = tpu.matmul %1, %2, %cst {dimension_numbers = #tpu.dot_dimension_numbers<[1], [0], [0], [1], [0, 0, 1, 1], [], []>} : vector<2x32xbf16>, vector<32x16xbf16>, vector<2x16xf32> -> vector<2x16xf32>
    %c0_3 = arith.constant 0 : index
    %c0_4 = arith.constant 0 : index
    %4 = vector.load %arg3[%c0_3, %c0_4] : memref<1x16xf32, #tpu.memory_space<vmem>>, vector<1x16xf32>
    %5 = vector.broadcast %4 : vector<1x16xf32> to vector<2x16xf32>
    %6 = arith.addf %3, %5 : vector<2x16xf32>
    %c0_5 = arith.constant 0 : index
    %c0_6 = arith.constant 0 : index
    %7 = vector.load %arg4[%c0_5, %c0_6] : memref<2x16xf32, #tpu.memory_space<vmem>>, vector<2x16xf32>
    tpu.vector_store %arg4[%c0_5, %c0_6], %6 {strides = array<i32>} : memref<2x16xf32, #tpu.memory_space<vmem>>, vector<2x16xf32>,
    return
  }
  func.func @transform_0(%arg0: i32) -> (i32, i32) {
    %c0_i32 = arith.constant 0 : i32
    %c0_i32_0 = arith.constant 0 : i32
    return %arg0, %c0_i32 : i32, i32
  }
  func.func @transform_1(%arg0: i32) -> (i32, i32) {
    %c0_i32 = arith.constant 0 : i32
    %c0_i32_0 = arith.constant 0 : i32
    %c0_i32_1 = arith.constant 0 : i32
    return %c0_i32, %c0_i32_0 : i32, i32
  }
  func.func @transform_2(%arg0: i32) -> (i32, i32) {
    %c0_i32 = arith.constant 0 : i32
    %c0_i32_0 = arith.constant 0 : i32
    %c0_i32_1 = arith.constant 0 : i32
    return %c0_i32, %c0_i32_0 : i32, i32
  }
  func.func @transform_3(%arg0: i32) -> (i32, i32) {
    %c0_i32 = arith.constant 0 : i32
    %c0_i32_0 = arith.constant 0 : i32
    return %arg0, %c0_i32 : i32, i32
  }
}

</mosaic_0001>

<bundles_post_ra>
// kernel: mlp_forward.1
= control target key start
LH: loop header
LB: loop body
LE: loop exit
PB: predicated region body
PF: predicated region fallthrough
CT: control target
= control target key end

     0   :  { %v143_v1 = vmov 0.0   ;;  %vm144_vm0 = vmmov 0   ;;  %s181_s0 = inlined_call_operand.vmem [shape: f32[2,32], index: 0, kind: input, shape index: {}]   ;;  %s182_s1 = inlined_call_operand.vmem [shape: bf16[32,16], index: 1, kind: input, shape index: {}]   ;;  %s183_s2 = inlined_call_operand.vmem [shape: f32[1,16], index: 2, kind: input, shape index: {}]   ;;  %s184_s3 = inlined_call_operand.hbm [shape: f32[2,16], index: 3, kind: output, shape index: {}]  }
   0x1   :  { %v119_v0 = vld [vmem:[%s182_s1 + $0x8] sm:$0xff]   ;;  %108 = vmatprep.subr.bf16.mxu0 %v143_v1  ;;  %v120_v2 = vld [vmem:[%s182_s1] sm:$0xff]   ;;  %112 = vmatprep.mubr.msk.bf16.mxu0 %vm144_vm0, %v143_v1 }
   0x2   :  { %109 = vmatpush3.bf16.msra.mxu0 %v119_v0  ;;  %v16_v3 = vld [vmem:[%s181_s0] sm:$0x3] }
   0x3   :  { %110 = vmatprep.subr.bf16.mxu0 %v143_v1 }
   0x4   :  { %8 = vsyncpa [#allocation3], 0  ;;  %v17_v4 = vpack.c.bf16 %v16_v3, %v16_v3  ;;  %vm41_vm1 = vcmask 261120   ;;  %v101_v5 = vld [vmem:[%s183_s2] ss:$0 sm:$0xff]  ;;  %s145_s20 = smov [#allocation2]  }
   0x5   :  { %s93_s21 = sshll.u32 %s145_s20, 4  ;;  %vm85_vm2 = vcmask 123904   ;;  %s94_s21 = int_to_ptr.vmem [resolvable:$true] %s93_s21 }
   0x6   :  { %111 = vmatpush3.bf16.msra.mxu0 %v120_v2  ;;  %s121_s0 = scalar_lea.vmem %s94_s21, 32  ;;  %p126_p1 = scmp.lt.s32.totalorder %s94_s21, %s94_s21 }
   0x7   :  { %p122_p0 = scmp.ne.s32.totalorder %s94_s21, %s121_s0  ;;  %p127_p2 = scmp.lt.s32.totalorder %s121_s0, %s121_s0 }
   0x9   :  { %113 = vmatmul.mubr.msk.bf16.vlgmr.msra.gmra.mxu0 %vm41_vm1, %v17_v4  ;;  %p128_p3 = por %p127_p2, %p126_p1 }
   0xb   :  { %p129_p4 = pnand %p128_p3, %p122_p0 }
  0xc9   :  { %v79_v6 = vpop.f32.mrf.mxu0 }
  0xca   :  { %v80_v7 = vadd.f32 %v101_v5, %v79_v6 }
  0xcb   :  { %v114_v8 = vpop.f32.mrf.mxu0 }
  0xcc   :  { %86 = vst.msk [vmem:[#allocation2] sm:$0x3] %vm85_vm2, %v80_v7 }
  0xcd   :  { %v82_v9 = vpop.f32.mrf.mxu0 }
  0xce   :  { %132 = shalt.err (!%p129_p4)
}
  0xcf   :  { %96 = dma.vmem_to_hbm [thread:$0]  %s94_s21, 32, %s184_s3, [#allocation3]   ;;  %v115_v10 = vpop.f32.mrf.mxu0 }
  0xd0   :  { %141 = dma.done.wait [#allocation3], 32  }
  0xd1   :  { %142 = vsyncadd [#allocation3], 4294967264 }
  0xd2   :  { %100 = vsyncpa [#allocation3], 1 }

</bundles_post_ra>
